<compile_context>
chip_gen: v7x
topology: tpu7x:2x2x1
jax: 0.10.0
libtpu: 0.0.40
codegen_flags: <defaults>
</compile_context>

<pallas_src>
import jax
import jax.numpy as jnp
from jax.experimental import pallas as pl
from jax.experimental.pallas import tpu as pltpu


def actor_kernel(obs_ref, w1_ref, b1_ref, w2_ref, b2_ref, w3_ref, b3_ref,
                 out_ref):
    x = obs_ref[...]  # f32; kernel is overhead/memory-bound, f32 MXU is free

    # FC1 + ReLU
    h1 = jnp.dot(x, w1_ref[...], preferred_element_type=jnp.float32)
    h1 = jnp.maximum(h1 + b1_ref[...], 0.0)

    # FC2 + ReLU
    h2 = jnp.dot(h1, w2_ref[...], preferred_element_type=jnp.float32)
    h2 = jnp.maximum(h2 + b2_ref[...], 0.0)

    # FC3 + ReLU
    h3 = jnp.dot(h2, w3_ref[...], preferred_element_type=jnp.float32)
    h3 = jnp.maximum(h3 + b3_ref[...], 0.0)

    # Softmax over the action (last) dim, exact normalization.
    m = jnp.max(h3, axis=-1, keepdims=True)
    e = jnp.exp(h3 - m)
    denom = jnp.sum(e, axis=-1, keepdims=True)
    out_ref[...] = (e / denom).astype(out_ref.dtype)


def _round_up(x, m):
    return (x + m - 1) // m * m


def _choose_tile(batch, tb_max):
    """Batch tile: multiple of 8, as large as possible, but prefer >= 2
    (roughly balanced) grid steps so v7x megacore has work for both cores."""
    tb_max = max(8, _round_up(tb_max, 8))
    b8 = _round_up(batch, 8)
    if b8 <= 8:
        return 8
    half = _round_up((b8 + 1) // 2, 8)   # two balanced steps if it fits
    return max(8, min(tb_max, half))


def actor_forward(obs, params, *, tb_max=4096):
    """obs: (B, dim_observation) float32 -> (B, dim_action) float32."""
    w1, b1, w2, b2, w3, b3 = params
    B, dim_obs = obs.shape
    dim_action = w3.shape[1]

    tb = _choose_tile(B, tb_max)
    nb = pl.cdiv(B, tb)                  # ragged last block handled by Pallas

    vmem = pltpu.MemorySpace.VMEM

    def resident(a):
        # Full-array block, same block index every grid step -> stays in VMEM.
        return pl.BlockSpec(a.shape, lambda i: (0, 0), memory_space=vmem)

    flops = 2 * B * (dim_obs * 32 + 32 * 16 + 16 * dim_action)
    param_bytes = sum(int(a.size) * a.dtype.itemsize
                      for a in (w1, b1, w2, b2, w3, b3))
    cost = pl.CostEstimate(
        flops=flops,
        transcendentals=B * dim_action,                      # exp in softmax
        bytes_accessed=B * (dim_obs + dim_action) * 4 + param_bytes,
    )

    return pl.pallas_call(
        actor_kernel,
        out_shape=jax.ShapeDtypeStruct((B, dim_action), jnp.float32),
        grid=(nb,),
        in_specs=[
            pl.BlockSpec((tb, dim_obs), lambda i: (i, 0), memory_space=vmem),
            resident(w1), resident(b1),
            resident(w2), resident(b2),
            resident(w3), resident(b3),
        ],
        out_specs=pl.BlockSpec((tb, dim_action), lambda i: (i, 0),
                               memory_space=vmem),
        compiler_params=pltpu.CompilerParams(
            dimension_semantics=("parallel",)),
        cost_estimate=cost,
    )(obs, w1, b1, w2, b2, w3, b3)


def init_params(key, dim_observation, dim_action):
    """Deterministic init mimicking nn.Linear default (uniform +-1/sqrt(fan_in))."""
    dims = [(dim_observation, 32), (32, 16), (16, dim_action)]
    params = []
    for fan_in, fan_out in dims:
        kw, kb, key = jax.random.split(key, 3)
        bound = 1.0 / jnp.sqrt(fan_in)
        w = jax.random.uniform(kw, (fan_in, fan_out), jnp.float32,
                               minval=-bound, maxval=bound)
        b = jax.random.uniform(kb, (1, fan_out), jnp.float32,
                               minval=-bound, maxval=bound)
        params.extend([w, b])
    return tuple(params)


def actor_reference(obs, params):
    """Pure-JAX f32 reference (matches the PyTorch module)."""
    w1, b1, w2, b2, w3, b3 = params
    h = jnp.maximum(obs @ w1 + b1, 0.0)
    h = jnp.maximum(h @ w2 + b2, 0.0)
    h = jnp.maximum(h @ w3 + b3, 0.0)
    return jax.nn.softmax(h, axis=-1)


if __name__ == "__main__":
    key = jax.random.PRNGKey(0)
    k_obs, k_params, k_obs2 = jax.random.split(key, 3)

    B = 2
    dim_observation = 32
    dim_action = 8

    obs = jax.random.normal(k_obs, (B, dim_observation), jnp.float32)
    params = init_params(k_params, dim_observation, dim_action)

    out = jax.block_until_ready(actor_forward(obs, params))

    # Shape, exact softmax normalization, and agreement with f32 reference.
    assert out.shape == (B, dim_action)
    assert jnp.allclose(jnp.sum(out, axis=-1), 1.0, atol=1e-5)
    ref = actor_reference(obs, params)
    assert jnp.allclose(out, ref, atol=5e-3), float(jnp.max(jnp.abs(out - ref)))

    # Also exercise a multi-step grid with a ragged last block.
    B2 = 300
    obs2 = jax.random.normal(k_obs2, (B2, dim_observation), jnp.float32)
    out2 = jax.block_until_ready(actor_forward(obs2, params))
    assert out2.shape == (B2, dim_action)
    assert jnp.allclose(jnp.sum(out2, axis=-1), 1.0, atol=1e-5)
    ref2 = actor_reference(obs2, params)
    assert jnp.allclose(out2, ref2, atol=5e-3), float(jnp.max(jnp.abs(out2 - ref2)))

    print("KERNEL_OK")
</pallas_src>

<mosaic_0001>
module attributes {stable_mosaic.version = 11 : i64} {
  func.func @actor_kernel(%arg0: i32, %arg1: memref<8x32xf32, #tpu.memory_space<vmem>>, %arg2: memref<32x32xf32, #tpu.memory_space<vmem>>, %arg3: memref<1x32xf32, #tpu.memory_space<vmem>>, %arg4: memref<32x16xf32, #tpu.memory_space<vmem>>, %arg5: memref<1x16xf32, #tpu.memory_space<vmem>>, %arg6: memref<16x8xf32, #tpu.memory_space<vmem>>, %arg7: memref<1x8xf32, #tpu.memory_space<vmem>>, %arg8: memref<8x8xf32, #tpu.memory_space<vmem>>) attributes {dimension_semantics = [#tpu.dimension_semantics<parallel>], iteration_bounds = array<i64: 1>, scalar_prefetch = 0 : i64, scratch_operands = 0 : i64, tpu.core_type = #tpu.core_type<tc>, window_params = [{transform_indices = @transform_0, window_bounds = array<i64: 8, 32>}, {pipeline_mode = #tpu.pipeline_mode<synchronous>, transform_indices = @transform_1, window_bounds = array<i64: 32, 32>}, {pipeline_mode = #tpu.pipeline_mode<synchronous>, transform_indices = @transform_2, window_bounds = array<i64: 1, 32>}, {pipeline_mode = #tpu.pipeline_mode<synchronous>, transform_indices = @transform_3, window_bounds = array<i64: 32, 16>}, {pipeline_mode = #tpu.pipeline_mode<synchronous>, transform_indices = @transform_4, window_bounds = array<i64: 1, 16>}, {pipeline_mode = #tpu.pipeline_mode<synchronous>, transform_indices = @transform_5, window_bounds = array<i64: 16, 8>}, {pipeline_mode = #tpu.pipeline_mode<synchronous>, transform_indices = @transform_6, window_bounds = array<i64: 1, 8>}, {transform_indices = @transform_7, window_bounds = array<i64: 8, 8>}]} {
    %c0 = arith.constant 0 : index
    %c0_0 = arith.constant 0 : index
    %0 = vector.load %arg1[%c0, %c0_0] : memref<8x32xf32, #tpu.memory_space<vmem>>, vector<8x32xf32>
    %c0_1 = arith.constant 0 : index
    %c0_2 = arith.constant 0 : index
    %1 = vector.load %arg2[%c0_1, %c0_2] : memref<32x32xf32, #tpu.memory_space<vmem>>, vector<32x32xf32>
    %cst = arith.constant dense<0.000000e+00> : vector<8x32xf32>
    %2 = tpu.matmul %0, %1, %cst {dimension_numbers = #tpu.dot_dimension_numbers<[1], [0], [0], [1], [0, 0, 1, 1], [], []>} : vector<8x32xf32>, vector<32x32xf32>, vector<8x32xf32> -> vector<8x32xf32>
    %c0_3 = arith.constant 0 : index
    %c0_4 = arith.constant 0 : index
    %3 = vector.load %arg3[%c0_3, %c0_4] : memref<1x32xf32, #tpu.memory_space<vmem>>, vector<1x32xf32>
    %4 = vector.broadcast %3 : vector<1x32xf32> to vector<8x32xf32>
    %5 = arith.addf %2, %4 : vector<8x32xf32>
    %cst_5 = arith.constant 0.000000e+00 : f32
    %6 = vector.broadcast %cst_5 : f32 to vector<8x32xf32>
    %7 = arith.maximumf %5, %6 : vector<8x32xf32>
    %c0_6 = arith.constant 0 : index
    %c0_7 = arith.constant 0 : index
    %8 = vector.load %arg4[%c0_6, %c0_7] : memref<32x16xf32, #tpu.memory_space<vmem>>, vector<32x16xf32>
    %cst_8 = arith.constant dense<0.000000e+00> : vector<8x16xf32>
    %9 = tpu.matmul %7, %8, %cst_8 {dimension_numbers = #tpu.dot_dimension_numbers<[1], [0], [0], [1], [0, 0, 1, 1], [], []>} : vector<8x32xf32>, vector<32x16xf32>, vector<8x16xf32> -> vector<8x16xf32>
    %c0_9 = arith.constant 0 : index
    %c0_10 = arith.constant 0 : index
    %10 = vector.load %arg5[%c0_9, %c0_10] : memref<1x16xf32, #tpu.memory_space<vmem>>, vector<1x16xf32>
    %11 = vector.broadcast %10 : vector<1x16xf32> to vector<8x16xf32>
    %12 = arith.addf %9, %11 : vector<8x16xf32>
    %cst_11 = arith.constant 0.000000e+00 : f32
    %13 = vector.broadcast %cst_11 : f32 to vector<8x16xf32>
    %14 = arith.maximumf %12, %13 : vector<8x16xf32>
    %c0_12 = arith.constant 0 : index
    %c0_13 = arith.constant 0 : index
    %15 = vector.load %arg6[%c0_12, %c0_13] : memref<16x8xf32, #tpu.memory_space<vmem>>, vector<16x8xf32>
    %cst_14 = arith.constant dense<0.000000e+00> : vector<8x8xf32>
    %16 = tpu.matmul %14, %15, %cst_14 {dimension_numbers = #tpu.dot_dimension_numbers<[1], [0], [0], [1], [0, 0, 1, 1], [], []>} : vector<8x16xf32>, vector<16x8xf32>, vector<8x8xf32> -> vector<8x8xf32>
    %c0_15 = arith.constant 0 : index
    %c0_16 = arith.constant 0 : index
    %17 = vector.load %arg7[%c0_15, %c0_16] : memref<1x8xf32, #tpu.memory_space<vmem>>, vector<1x8xf32>
    %18 = vector.broadcast %17 : vector<1x8xf32> to vector<8x8xf32>
    %19 = arith.addf %16, %18 : vector<8x8xf32>
    %cst_17 = arith.constant 0.000000e+00 : f32
    %20 = vector.broadcast %cst_17 : f32 to vector<8x8xf32>
    %21 = arith.maximumf %19, %20 : vector<8x8xf32>
    %cst_18 = arith.constant dense<0xFF800000> : vector<8xf32>
    %22 = vector.multi_reduction <maximumf>, %21, %cst_18 [1] : vector<8x8xf32> to vector<8xf32>
    %23 = vector.shape_cast %22 : vector<8xf32> to vector<8x1xf32>
    %24 = vector.broadcast %23 : vector<8x1xf32> to vector<8x8xf32>
    %25 = arith.subf %21, %24 : vector<8x8xf32>
    %26 = math.exp %25 : vector<8x8xf32>
    %cst_19 = arith.constant dense<0.000000e+00> : vector<8xf32>
    %27 = vector.multi_reduction <add>, %26, %cst_19 [1] : vector<8x8xf32> to vector<8xf32>
    %28 = vector.shape_cast %27 : vector<8xf32> to vector<8x1xf32>
    %29 = vector.broadcast %28 : vector<8x1xf32> to vector<8x8xf32>
    %30 = arith.divf %26, %29 : vector<8x8xf32>
    %c0_20 = arith.constant 0 : index
    %c0_21 = arith.constant 0 : index
    %31 = vector.load %arg8[%c0_20, %c0_21] : memref<8x8xf32, #tpu.memory_space<vmem>>, vector<8x8xf32>
    tpu.vector_store %arg8[%c0_20, %c0_21], %30 {strides = array<i32>} : memref<8x8xf32, #tpu.memory_space<vmem>>, vector<8x8xf32>,
    return
  }
  func.func @transform_0(%arg0: i32) -> (i32, i32) {
    %c0_i32 = arith.constant 0 : i32
    %c0_i32_0 = arith.constant 0 : i32
    return %arg0, %c0_i32 : i32, i32
  }
  func.func @transform_1(%arg0: i32) -> (i32, i32) {
    %c0_i32 = arith.constant 0 : i32
    %c0_i32_0 = arith.constant 0 : i32
    %c0_i32_1 = arith.constant 0 : i32
    return %c0_i32, %c0_i32_0 : i32, i32
  }
  func.func @transform_2(%arg0: i32) -> (i32, i32) {
    %c0_i32 = arith.constant 0 : i32
    %c0_i32_0 = arith.constant 0 : i32
    %c0_i32_1 = arith.constant 0 : i32
    return %c0_i32, %c0_i32_0 : i32, i32
  }
  func.func @transform_3(%arg0: i32) -> (i32, i32) {
    %c0_i32 = arith.constant 0 : i32
    %c0_i32_0 = arith.constant 0 : i32
    %c0_i32_1 = arith.constant 0 : i32
    return %c0_i32, %c0_i32_0 : i32, i32
  }
  func.func @transform_4(%arg0: i32) -> (i32, i32) {
    %c0_i32 = arith.constant 0 : i32
    %c0_i32_0 = arith.constant 0 : i32
    %c0_i32_1 = arith.constant 0 : i32
    return %c0_i32, %c0_i32_0 : i32, i32
  }
  func.func @transform_5(%arg0: i32) -> (i32, i32) {
    %c0_i32 = arith.constant 0 : i32
    %c0_i32_0 = arith.constant 0 : i32
    %c0_i32_1 = arith.constant 0 : i32
    return %c0_i32, %c0_i32_0 : i32, i32
  }
  func.func @transform_6(%arg0: i32) -> (i32, i32) {
    %c0_i32 = arith.constant 0 : i32
    %c0_i32_0 = arith.constant 0 : i32
    %c0_i32_1 = arith.constant 0 : i32
    return %c0_i32, %c0_i32_0 : i32, i32
  }
  func.func @transform_7(%arg0: i32) -> (i32, i32) {
    %c0_i32 = arith.constant 0 : i32
    %c0_i32_0 = arith.constant 0 : i32
    return %arg0, %c0_i32 : i32, i32
  }
}

</mosaic_0001>

<bundles_post_ra>
// kernel: tpu_custom_call.1
= control target key start
LH: loop header
LB: loop body
LE: loop exit
PB: predicated region body
PF: predicated region fallthrough
CT: control target
= control target key end

     0   :  { %12 = vsyncpa [#allocation3], 0  ;;  %v409_v2 = vmov 0.0|0.0   ;;  %vm410_vm0 = vmmov 0   ;;  %v411_v6 = vmov 0.0   ;;  %vm39_vm1 = vcmask 261120   ;;  %s512_s0 = inlined_call_operand.vmem [shape: f32[2,32], index: 0, kind: input, shape index: {}]   ;;  %s513_s1 = inlined_call_operand.vmem [shape: f32[32,32], index: 1, kind: input, shape index: {}]   ;;  %s514_s2 = inlined_call_operand.vmem [shape: f32[1,32], index: 2, kind: input, shape index: {}]   ;;  %s515_s3 = inlined_call_operand.vmem [shape: f32[32,16], index: 3, kind: input, shape index: {}]   ;;  %s516_s4 = inlined_call_operand.vmem [shape: f32[1,16], index: 4, kind: input, shape index: {}]   ;;  %s517_s5 = inlined_call_operand.vmem [shape: f32[16,8], index: 5, kind: input, shape index: {}]   ;;  %s518_s6 = inlined_call_operand.vmem [shape: f32[1,8], index: 6, kind: input, shape index: {}]   ;;  %s519_s7 = inlined_call_operand.hbm [shape: f32[2,8], index: 7, kind: output, shape index: {}]  }
   0x1   :  { %v28_v0 = vld [vmem:[%s513_s1] sm:$0xff]  ;;  %v29_v1 = vld [vmem:[%s513_s1 + $0x8] sm:$0xff]  ;;  %360 = vmatprep.subr.bf16.mxu0 %v409_v2  ;;  %v30_v4 = vld [vmem:[%s513_s1 + $0x10] sm:$0xff]  ;;  %366 = vmatprep.subr.bf16.mxu1 %v409_v2  ;;  %vm208_vm2 = vcmask 130048   ;;  %vm283_vm3 = vcmask 64512  }
   0x2   :  { %v361_v3 = vpack.c.bf16 %v29_v1, %v28_v0  ;;  %v31_v5 = vld [vmem:[%s513_s1 + $0x18] sm:$0xff]  ;;  %339 = vmatprep.mubr.msk.f32.mxu0 %vm410_vm0, %v411_v6  ;;  %v114_v7 = vld [vmem:[%s515_s3] sm:$0xff]  ;;  %v115_v8 = vld [vmem:[%s515_s3 + $0x8] sm:$0xff]  ;;  %350 = vmatprep.mubr.msk.f32.mxu1 %vm410_vm0, %v411_v6 }
   0x3   :  { %v364_v9 = vpack.c.bf16 %v31_v5, %v30_v4  ;;  %v367_v10 = vpack.c.bf16 %v115_v8, %v114_v7  ;;  %v27_v11 = vld [vmem:[%s512_s0] sm:$0xff]  ;;  %v116_v12 = vld [vmem:[%s515_s3 + $0x10] sm:$0xff]  ;;  %v117_v13 = vld [vmem:[%s515_s3 + $0x18] sm:$0xff] }
   0x4   :  { %362 = vmatpush3.bf16.msra.mxu0 %v361_v3  ;;  %v370_v14 = vpack.c.bf16 %v117_v13, %v116_v12  ;;  %v312_v15 = vld [vmem:[%s514_s2] ss:$0 sm:$0xff]  ;;  %v200_v21 = vld [vmem:[%s517_s5 + $0x8] sm:$0xff] }
   0x5   :  { %363 = vmatprep.subr.bf16.mxu0 %v409_v2  ;;  %368 = vmatpush3.bf16.msra.mxu1 %v367_v10  ;;  %v199_v20 = vld [vmem:[%s517_s5] sm:$0xff] }
   0x6   :  { %369 = vmatprep.subr.bf16.mxu1 %v409_v2  ;;  %v373_v22 = vpack.c.bf16 %v200_v21, %v199_v20  ;;  %v314_v23 = vld [vmem:[%s516_s4] ss:$0 sm:$0xff] }
   0x7   :  { %v316_v28 = vld [vmem:[%s518_s6] ss:$0 sm:$0xff] }
   0x8   :  { %365 = vmatpush3.bf16.msra.mxu0 %v364_v9 }
   0x9   :  { %372 = vmatprep.subr.bf16.mxu0 %v409_v2  ;;  %371 = vmatpush3.bf16.msra.mxu1 %v370_v14 }
   0xb   :  { %340 = vmatmul.mubr.msk.f32.vlgmr.msra.gmra.mrb[0].mxu0 %vm39_vm1, %v27_v11 }
   0xc   :  { %357 = vmatprep.mubr.msk.f32.mxu0 %vm410_vm0, %v411_v6  ;;  %374 = vmatpush3.bf16.msra.mxu0 %v373_v22 }
  0xde   :  { %v109_v16 = vpop.f32.mrb[0].mxu0 }
  0xdf   :  { %v110_v17 = vadd.f32 %v312_v15, %v109_v16  ;;  %v341_v18 = vpop.f32.mrb[1].mxu0 }
  0xe1   :  { %v113_v19 = vmax.f32 %v110_v17, 0.0 }
  0xe3   :  { %351 = vmatmul.mubr.msk.f32.vlgmr.msra.gmra.mrb[0].mxu1 %vm39_vm1, %v113_v19 }
 0x1b6   :  { %v194_v24 = vpop.f32.mrb[0].mxu1 }
 0x1b7   :  { %v195_v25 = vadd.f32 %v314_v23, %v194_v24  ;;  %v352_v26 = vpop.f32.mrb[1].mxu1 }
 0x1b9   :  { %v198_v27 = vmax.f32 %v195_v25, 0.0 }
 0x1bb   :  { %358 = vmatmul.mubr.msk.f32.vlgmr.msra.gmra.mrb[2].mxu0 %vm208_vm2, %v198_v27 }
 0x28e   :  { %v278_v29 = vpop.f32.mrb[2].mxu0 }
 0x28f   :  { %v279_v30 = vadd.f32 %v316_v28, %v278_v29  ;;  %v359_v31 = vpop.f32.mrb[3].mxu0 }
 0x291   :  { %v282_v32 = vmax.f32 %v279_v30, 0.0 }
 0x293   :  { %v284_v33 = vsel %vm283_vm3, %v282_v32, -inf }
 0x294   :  { %285 = vmax.xlane.f32.xlu0 %v284_v33 }
 0x321   :  { %v286_v34 = vpop.xlane.xlu0 %285 }
 0x322   :  { %v287_v35 = vsub.f32 %v282_v32, %v286_v34 }
 0x324   :  { %v288_v36 = vmul.f32 1.442695, %v287_v35 }
 0x326   :  { %381 = vpow2.f32 %v288_v36 }
 0x330   :  { %v382_v37 = vpop.eup %381 }
 0x331   :  { %v290_v38 = vsel %vm283_vm3, %v382_v37, 0.0 }
 0x332   :  { %291 = vadd.xlane.f32.xlu0 %v290_v38 }
 0x3bf   :  { %v292_v39 = vpop.xlane.xlu0 %291 }
 0x3c0   :  { %383 = vrcp.f32 %v292_v39 }
 0x3ca   :  { %v384_v40 = vpop.eup %383 }
 0x3cb   :  { %v294_v41 = vmul.f32 %v384_v40, %v382_v37 }
 0x3cd   :  { %295 = vst.msk [vmem:[#allocation2] sm:$0xff] %vm283_vm3, %v294_v41 }
 0x3ce   :  { %300 = vsyncadd [#allocation3], 96  ;;  %s412_s4 = smov [#allocation2]  }
 0x3cf   :  { %s301_s5 = sshll.u32 %s412_s4, 4  ;;  %s302_s5 = int_to_ptr.vmem [resolvable:$true] %s301_s5 }
 0x3d0   :  { %s385_s6 = scalar_lea.vmem %s302_s5, 32  ;;  %s389_s25 = scalar_lea.vmem %s302_s5, 128 }
 0x3d1   :  { %p386_p0 = scmp.ne.s32.totalorder %s302_s5, %s385_s6  ;;  %p390_p1 = scmp.lt.s32.totalorder %s302_s5, %s302_s5 }
 0x3d2   :  { %p391_p2 = scmp.lt.s32.totalorder %s389_s25, %s385_s6 }
 0x3d4   :  { %p392_p3 = por %p391_p2, %p390_p1 }
 0x3d6   :  { %p393_p4 = pnand %p392_p3, %p386_p0 }
 0x3d8   :  { %396 = shalt.err (!%p393_p4)
}
 0x3d9   :  { %s397_s28 = scalar_lea.hbm %s519_s7, 32 }
 0x3da   :  { %p398_p5 = scmp.ne.s32.totalorder %s519_s7, %s397_s28  ;;  %p401_p6 = scmp.lt.u32.totalorder %s397_s28, %s519_s7 }
 0x3dc   :  { %p403_p7 = pnand %p401_p6, %p398_p5 }
 0x3de   :  { %406 = shalt.err (!%p403_p7)
}
 0x3df   :  { %s413_s10 = smov 32   ;;  %s414_s11 = smov 2  }
 0x3e0   :  { %307 = dma.vmem_to_hbm [thread:$0]  %s302_s5, 32, %s519_s7, [#allocation3], %s413_s10, %s413_s10, %s414_s11  }
 0x3e1   :  { %407 = dma.done.wait [#allocation3], 128  }
 0x3e2   :  { %408 = vsyncadd [#allocation3], 4294967168 }
 0x3e3   :  { %311 = vsyncpa [#allocation3], 1 }

</bundles_post_ra>
